<compile_context>
chip_gen: v5e
topology: v5e:2x2
jax: 0.10.0
libtpu: 0.0.40
codegen_flags: <defaults>
</compile_context>

<pallas_src>
import functools

import jax
import jax.numpy as jnp
from jax import lax
from jax.experimental import pallas as pl
from jax.experimental.pallas import tpu as pltpu


# ----------------------------------------------------------------------------
# Tiling helpers
# ----------------------------------------------------------------------------
_TM_CANDIDATES = (512, 256, 128)  # cap 512 keeps VMEM usage well under 64 MiB


def _pad_lanes(a, mult=128):
    """Pad the last (lane) dim up to a multiple of `mult`.  Returns (padded, orig)."""
    m = a.shape[-1]
    mp = ((m + mult - 1) // mult) * mult
    if mp != m:
        pad = [(0, 0)] * (a.ndim - 1) + [(0, mp - m)]
        a = jnp.pad(a, pad)
    return a, m


def _pick_tm(mp):
    """Largest TM <= 512 dividing mp, preferring >=2 grid steps (v7x megacore)."""
    for tm in _TM_CANDIDATES:
        if mp % tm == 0 and mp // tm >= 2:
            return tm
    for tm in _TM_CANDIDATES:
        if mp % tm == 0:
            return tm
    return 128


# ----------------------------------------------------------------------------
# Pallas kernels (all operate on (C, M) tiles; M on lanes)
# ----------------------------------------------------------------------------
def _mm_bn_kernel(w_ref, x_ref, s_ref, b_ref, o_ref, *, relu):
    # 1x1 conv == (Cout, Cin) @ (Cin, TM); fused folded-BN epilogue in f32.
    y = jnp.dot(w_ref[...], x_ref[...], preferred_element_type=jnp.float32)
    y = y * s_ref[...] + b_ref[...]
    if relu:
        y = jnp.maximum(y, 0.0)
    o_ref[...] = y.astype(o_ref.dtype)


def _grouped_mm_bn_relu_kernel(w_ref, x_ref, s_ref, b_ref, o_ref):
    # One "group pack": block-diagonal (pw, 9*pw) @ im2col patches (9*pw, TM).
    y = jnp.dot(w_ref[0], x_ref[0], preferred_element_type=jnp.float32)
    y = y * s_ref[0] + b_ref[0]
    o_ref[...] = jnp.maximum(y, 0.0).astype(o_ref.dtype)


def _out_proj_kernel(w3_ref, y_ref, s3_ref, b3_ref,
                     ws_ref, x_ref, ss_ref, bs_ref, o_ref):
    # Fused: conv3 + BN3 + projection-shortcut conv + BNs + residual + ReLU.
    main = jnp.dot(w3_ref[...], y_ref[...], preferred_element_type=jnp.float32)
    main = main * s3_ref[...] + b3_ref[...]
    sc = jnp.dot(ws_ref[...], x_ref[...], preferred_element_type=jnp.float32)
    sc = sc * ss_ref[...] + bs_ref[...]
    o_ref[...] = jnp.maximum(main + sc, 0.0).astype(o_ref.dtype)


def _out_identity_kernel(w3_ref, y_ref, s3_ref, b3_ref, r_ref, o_ref):
    # Fused: conv3 + BN3 + identity residual + ReLU.
    main = jnp.dot(w3_ref[...], y_ref[...], preferred_element_type=jnp.float32)
    main = main * s3_ref[...] + b3_ref[...]
    o_ref[...] = jnp.maximum(main + r_ref[...].astype(jnp.float32), 0.0).astype(o_ref.dtype)


# ----------------------------------------------------------------------------
# Pallas wrappers
# ----------------------------------------------------------------------------
def pointwise_conv_bn(x_cm, w, scale, bias, *, relu, out_dtype=jnp.bfloat16):
    """x_cm: (Cin, M); w: (Cout, Cin).  Returns relu?((w @ x) * scale + bias)."""
    cout, cin = w.shape
    xp, m = _pad_lanes(x_cm)
    mp = xp.shape[-1]
    tm = _pick_tm(mp)
    out = pl.pallas_call(
        functools.partial(_mm_bn_kernel, relu=relu),
        out_shape=jax.ShapeDtypeStruct((cout, mp), out_dtype),
        grid=(mp // tm,),
        in_specs=[
            pl.BlockSpec((cout, cin), lambda i: (0, 0)),   # weight, resident
            pl.BlockSpec((cin, tm), lambda i: (0, i)),     # activation tile
            pl.BlockSpec((cout, 1), lambda i: (0, 0)),     # BN scale
            pl.BlockSpec((cout, 1), lambda i: (0, 0)),     # BN bias
        ],
        out_specs=pl.BlockSpec((cout, tm), lambda i: (0, i)),
        compiler_params=pltpu.CompilerParams(dimension_semantics=("parallel",)),
    )(w.astype(jnp.bfloat16), xp.astype(jnp.bfloat16),
      scale.reshape(cout, 1).astype(jnp.float32),
      bias.reshape(cout, 1).astype(jnp.float32))
    return out[:, :m]


def grouped_conv3x3_bn_relu(y_cm, shape_nhw, w2, scale, bias, *, stride, groups,
                            out_dtype=jnp.bfloat16):
    """Grouped 3x3 conv (pad=1, stride) + BN + ReLU.

    y_cm: (C, N*H*W) channels-first activations; w2: PyTorch (C, C//groups, 3, 3).
    Groups are packed into block-diagonal weights so the kernel output keeps the
    full channel range (lane-dense M on lanes, channels on sublanes)."""
    C = y_cm.shape[0]
    N, H, W = shape_nhw
    gw = C // groups
    Ho = (H + 2 - 3) // stride + 1
    Wo = (W + 2 - 3) // stride + 1
    Mo = N * Ho * Wo

    # Pick groups-per-pack so packed width pw = gp*gw is a multiple of 8, <= 128.
    gp = None
    limit = max(1, 128 // gw)
    for cand in range(min(groups, limit), 0, -1):
        if groups % cand == 0 and (cand * gw) % 8 == 0:
            gp = cand
            break
    if gp is None:
        gp = groups            # single pack => full-channel blocks (always legal)
    P = groups // gp
    pw = gp * gw

    # im2col taps (plain-JAX glue for now; see TODO at top of file).
    y4 = y_cm.reshape(C, N, H, W)
    yp = jnp.pad(y4, ((0, 0), (0, 0), (1, 1), (1, 1)))
    taps = []
    for ky in range(3):
        for kx in range(3):
            taps.append(yp[:, :, ky:ky + (Ho - 1) * stride + 1:stride,
                               kx:kx + (Wo - 1) * stride + 1:stride])
    patches = jnp.stack(taps, axis=0).reshape(9, C, Mo)              # (9, C, Mo)
    patches = patches.reshape(9, P, pw, Mo).transpose(1, 0, 2, 3)    # (P, 9, pw, Mo)
    patches = patches.reshape(P, 9 * pw, Mo)
    patches, mo = _pad_lanes(patches)
    mop = patches.shape[-1]
    tm = _pick_tm(mop)

    # Block-diagonal packed weights: (P, pw, 9*pw).
    wk = jnp.transpose(w2.reshape(groups, gw, gw, 3, 3), (0, 1, 3, 4, 2))  # g,o,ky,kx,ci
    wk = wk.reshape(P, gp, gw, 9, gw)                                      # p,g,o,k,ci
    eye = jnp.eye(gp, dtype=wk.dtype)
    wbd = jnp.einsum('pgokc,gh->pgokhc', wk, eye).reshape(P, pw, 9 * pw)

    sg = scale.reshape(P, pw, 1).astype(jnp.float32)
    bg = bias.reshape(P, pw, 1).astype(jnp.float32)

    out = pl.pallas_call(
        _grouped_mm_bn_relu_kernel,
        out_shape=jax.ShapeDtypeStruct((C, mop), out_dtype),
        grid=(P, mop // tm),
        in_specs=[
            pl.BlockSpec((1, pw, 9 * pw), lambda p, j: (p, 0, 0)),  # packed weights
            pl.BlockSpec((1, 9 * pw, tm), lambda p, j: (p, 0, j)),  # im2col tile
            pl.BlockSpec((1, pw, 1), lambda p, j: (p, 0, 0)),       # BN scale
            pl.BlockSpec((1, pw, 1), lambda p, j: (p, 0, 0)),       # BN bias
        ],
        out_specs=pl.BlockSpec((pw, tm), lambda p, j: (p, j)),
        compiler_params=pltpu.CompilerParams(
            dimension_semantics=("parallel", "parallel")),
    )(wbd.astype(jnp.bfloat16), patches.astype(jnp.bfloat16), sg, bg)

    return out[:, :mo], (Ho, Wo)


def final_conv_residual(y_cm, w3, s3, b3, residual, *, proj=None):
    """out = relu(bn3(w3 @ y) + shortcut), shortcut = bn_s(ws @ residual) if proj
    else the identity `residual`.  All fused into one kernel."""
    cout, cin_main = w3.shape
    assert residual.shape[-1] == y_cm.shape[-1]
    yp, m = _pad_lanes(y_cm)
    rp, _ = _pad_lanes(residual)
    mp = yp.shape[-1]
    tm = _pick_tm(mp)
    common = dict(
        out_shape=jax.ShapeDtypeStruct((cout, mp), jnp.float32),
        grid=(mp // tm,),
        compiler_params=pltpu.CompilerParams(dimension_semantics=("parallel",)),
    )
    if proj is not None:
        ws, ss, bs = proj
        cin_sc = ws.shape[1]
        out = pl.pallas_call(
            _out_proj_kernel,
            in_specs=[
                pl.BlockSpec((cout, cin_main), lambda i: (0, 0)),
                pl.BlockSpec((cin_main, tm), lambda i: (0, i)),
                pl.BlockSpec((cout, 1), lambda i: (0, 0)),
                pl.BlockSpec((cout, 1), lambda i: (0, 0)),
                pl.BlockSpec((cout, cin_sc), lambda i: (0, 0)),
                pl.BlockSpec((cin_sc, tm), lambda i: (0, i)),
                pl.BlockSpec((cout, 1), lambda i: (0, 0)),
                pl.BlockSpec((cout, 1), lambda i: (0, 0)),
            ],
            out_specs=pl.BlockSpec((cout, tm), lambda i: (0, i)),
            **common,
        )(w3.astype(jnp.bfloat16), yp.astype(jnp.bfloat16),
          s3.reshape(cout, 1).astype(jnp.float32),
          b3.reshape(cout, 1).astype(jnp.float32),
          ws.astype(jnp.bfloat16), rp.astype(jnp.bfloat16),
          ss.reshape(cout, 1).astype(jnp.float32),
          bs.reshape(cout, 1).astype(jnp.float32))
    else:
        out = pl.pallas_call(
            _out_identity_kernel,
            in_specs=[
                pl.BlockSpec((cout, cin_main), lambda i: (0, 0)),
                pl.BlockSpec((cin_main, tm), lambda i: (0, i)),
                pl.BlockSpec((cout, 1), lambda i: (0, 0)),
                pl.BlockSpec((cout, 1), lambda i: (0, 0)),
                pl.BlockSpec((cout, tm), lambda i: (0, i)),
            ],
            out_specs=pl.BlockSpec((cout, tm), lambda i: (0, i)),
            **common,
        )(w3.astype(jnp.bfloat16), yp.astype(jnp.bfloat16),
          s3.reshape(cout, 1).astype(jnp.float32),
          b3.reshape(cout, 1).astype(jnp.float32),
          rp.astype(jnp.float32))
    return out[:, :m]


# ----------------------------------------------------------------------------
# XBlock forward (Pallas path)
# ----------------------------------------------------------------------------
def fold_bn(gamma, beta, mean, var, eps=1e-5):
    scale = gamma / jnp.sqrt(var + eps)
    return scale, beta - mean * scale


def xblock_forward(x_nchw, p, *, stride, groups, has_shortcut):
    N, Cin, H, W = x_nchw.shape
    # Channels-first "CM" layout: channels on sublanes, flattened (N*H*W) on
    # lanes -> lane-dense stores in every kernel.
    x_cm = jnp.transpose(x_nchw, (1, 0, 2, 3)).reshape(Cin, N * H * W)

    inter = p["w1"].shape[0]
    cout = p["w3"].shape[0]

    # conv_block_1: 1x1 conv + BN + ReLU
    s1, b1 = fold_bn(*p["bn1"])
    y = pointwise_conv_bn(x_cm, p["w1"].reshape(inter, Cin), s1, b1, relu=True)

    # conv_block_2: grouped 3x3 conv (stride, pad=1) + BN + ReLU
    s2, b2 = fold_bn(*p["bn2"])
    y, (Ho, Wo) = grouped_conv3x3_bn_relu(y, (N, H, W), p["w2"], s2, b2,
                                          stride=stride, groups=groups)

    # conv_block_3 + shortcut + residual add + final ReLU (one fused kernel)
    s3, b3 = fold_bn(*p["bn3"])
    if has_shortcut:
        # TODO(synk): stride subsample is plain-JAX glue (not folded into BlockSpec).
        xs = x_cm.reshape(Cin, N, H, W)[:, :, ::stride, ::stride].reshape(Cin, -1)
        ss, bs = fold_bn(*p["bns"])
        out = final_conv_residual(y, p["w3"].reshape(cout, inter), s3, b3, xs,
                                  proj=(p["ws"].reshape(cout, Cin), ss, bs))
    else:
        out = final_conv_residual(y, p["w3"].reshape(cout, inter), s3, b3, x_cm,
                                  proj=None)

    return jnp.transpose(out.reshape(cout, N, Ho, Wo), (1, 0, 2, 3))  # NCHW


# ----------------------------------------------------------------------------
# Pure-JAX reference (lax.conv, f32) for correctness check
# ----------------------------------------------------------------------------
def _conv(x, w, stride=1, padding=0, groups=1):
    return lax.conv_general_dilated(
        x, w, (stride, stride), [(padding, padding), (padding, padding)],
        dimension_numbers=("NCHW", "OIHW", "NCHW"),
        feature_group_count=groups)


def _bn(x, prm, eps=1e-5):
    gamma, beta, mean, var = prm
    s = gamma / jnp.sqrt(var + eps)
    return x * s[None, :, None, None] + (beta - mean * s)[None, :, None, None]


def ref_forward(x, p, *, stride, groups, has_shortcut):
    sc = _bn(_conv(x, p["ws"], stride=stride), p["bns"]) if has_shortcut else x
    y = jax.nn.relu(_bn(_conv(x, p["w1"]), p["bn1"]))
    y = jax.nn.relu(_bn(_conv(y, p["w2"], stride=stride, padding=1,
                              groups=groups), p["bn2"]))
    y = _bn(_conv(y, p["w3"]), p["bn3"])
    return jax.nn.relu(y + sc)


# ----------------------------------------------------------------------------
# Parameter construction (deterministic, synthetic)
# ----------------------------------------------------------------------------
def make_bn_params(key, c):
    k1, k2, k3, k4 = jax.random.split(key, 4)
    gamma = 1.0 + 0.1 * jax.random.normal(k1, (c,), jnp.float32)
    beta = 0.1 * jax.random.normal(k2, (c,), jnp.float32)
    mean = 0.05 * jax.random.normal(k3, (c,), jnp.float32)
    var = 1.0 + 0.1 * jax.random.uniform(k4, (c,), jnp.float32)
    return (gamma, beta, mean, var)


def make_params(key, in_channels, out_channels, bottleneck_ratio, group_width):
    inter = out_channels // bottleneck_ratio
    groups = inter // group_width
    ks = jax.random.split(key, 8)
    p = {
        "w1": 0.1 * jax.random.normal(ks[0], (inter, in_channels, 1, 1), jnp.float32),
        "bn1": make_bn_params(ks[1], inter),
        "w2": 0.1 * jax.random.normal(ks[2], (inter, inter // groups, 3, 3), jnp.float32),
        "bn2": make_bn_params(ks[3], inter),
        "w3": 0.1 * jax.random.normal(ks[4], (out_channels, inter, 1, 1), jnp.float32),
        "bn3": make_bn_params(ks[5], out_channels),
        "ws": 0.1 * jax.random.normal(ks[6], (out_channels, in_channels, 1, 1), jnp.float32),
        "bns": make_bn_params(ks[7], out_channels),
    }
    return p, inter, groups


# ----------------------------------------------------------------------------
# Main
# ----------------------------------------------------------------------------
if __name__ == "__main__":
    in_channels, out_channels = 8, 16
    bottleneck_ratio, group_width, stride = 2, 4, 2
    N, H, W = 2, 16, 16

    key = jax.random.PRNGKey(0)
    kx, kp = jax.random.split(key)
    x = jax.random.normal(kx, (N, in_channels, H, W), jnp.float32)
    params, inter, groups = make_params(kp, in_channels, out_channels,
                                        bottleneck_ratio, group_width)
    has_shortcut = (stride != 1) or (in_channels != out_channels)

    fwd = jax.jit(functools.partial(xblock_forward, stride=stride,
                                    groups=groups, has_shortcut=has_shortcut))
    out = fwd(x, params)
    jax.block_until_ready(out)

    ref = ref_forward(x, params, stride=stride, groups=groups,
                      has_shortcut=has_shortcut)
    assert out.shape == ref.shape, (out.shape, ref.shape)
    # bf16 MXU inputs (per perf review) need a looser tolerance than pure f32.
    err = float(jnp.max(jnp.abs(out - ref)))
    if err > 5e-2:
        raise AssertionError(f"Pallas XBlock mismatch vs reference, max|diff|={err}")

    print("KERNEL_OK")
</pallas_src>

<mosaic_0001>
module attributes {stable_mosaic.version = 11 : i64} {
  func.func @_mm_bn_kernel(%arg0: i32, %arg1: memref<8x8xbf16, #tpu.memory_space<vmem>>, %arg2: memref<8x256xbf16, #tpu.memory_space<vmem>>, %arg3: memref<8x1xf32, #tpu.memory_space<vmem>>, %arg4: memref<8x1xf32, #tpu.memory_space<vmem>>, %arg5: memref<8x256xbf16, #tpu.memory_space<vmem>>) attributes {dimension_semantics = [#tpu.dimension_semantics<parallel>], iteration_bounds = array<i64: 2>, scalar_prefetch = 0 : i64, scratch_operands = 0 : i64, tpu.core_type = #tpu.core_type<tc>, window_params = [{pipeline_mode = #tpu.pipeline_mode<synchronous>, transform_indices = @transform_0, window_bounds = array<i64: 8, 8>}, {transform_indices = @transform_1, window_bounds = array<i64: 8, 256>}, {pipeline_mode = #tpu.pipeline_mode<synchronous>, transform_indices = @transform_2, window_bounds = array<i64: 8, 1>}, {pipeline_mode = #tpu.pipeline_mode<synchronous>, transform_indices = @transform_3, window_bounds = array<i64: 8, 1>}, {transform_indices = @transform_4, window_bounds = array<i64: 8, 256>}]} {
    %c0 = arith.constant 0 : index
    %c0_0 = arith.constant 0 : index
    %0 = vector.load %arg1[%c0, %c0_0] : memref<8x8xbf16, #tpu.memory_space<vmem>>, vector<8x8xbf16>
    %c0_1 = arith.constant 0 : index
    %c0_2 = arith.constant 0 : index
    %1 = vector.load %arg2[%c0_1, %c0_2] : memref<8x256xbf16, #tpu.memory_space<vmem>>, vector<8x256xbf16>
    %cst = arith.constant dense<0.000000e+00> : vector<8x256xf32>
    %2 = tpu.matmul %0, %1, %cst {dimension_numbers = #tpu.dot_dimension_numbers<[1], [0], [0], [1], [0, 0, 1, 1], [], []>} : vector<8x8xbf16>, vector<8x256xbf16>, vector<8x256xf32> -> vector<8x256xf32>
    %c0_3 = arith.constant 0 : index
    %c0_4 = arith.constant 0 : index
    %3 = vector.load %arg3[%c0_3, %c0_4] : memref<8x1xf32, #tpu.memory_space<vmem>>, vector<8x1xf32>
    %4 = vector.broadcast %3 : vector<8x1xf32> to vector<8x256xf32>
    %5 = arith.mulf %2, %4 : vector<8x256xf32>
    %c0_5 = arith.constant 0 : index
    %c0_6 = arith.constant 0 : index
    %6 = vector.load %arg4[%c0_5, %c0_6] : memref<8x1xf32, #tpu.memory_space<vmem>>, vector<8x1xf32>
    %7 = vector.broadcast %6 : vector<8x1xf32> to vector<8x256xf32>
    %8 = arith.addf %5, %7 : vector<8x256xf32>
    %cst_7 = arith.constant 0.000000e+00 : f32
    %9 = vector.broadcast %cst_7 : f32 to vector<8x256xf32>
    %10 = arith.maximumf %8, %9 : vector<8x256xf32>
    %11 = arith.truncf %10 : vector<8x256xf32> to vector<8x256xbf16>
    %c0_8 = arith.constant 0 : index
    %c0_9 = arith.constant 0 : index
    %12 = vector.load %arg5[%c0_8, %c0_9] : memref<8x256xbf16, #tpu.memory_space<vmem>>, vector<8x256xbf16>
    tpu.vector_store %arg5[%c0_8, %c0_9], %11 {strides = array<i32>} : memref<8x256xbf16, #tpu.memory_space<vmem>>, vector<8x256xbf16>,
    return
  }
  func.func @transform_0(%arg0: i32) -> (i32, i32) {
    %c0_i32 = arith.constant 0 : i32
    %c0_i32_0 = arith.constant 0 : i32
    %c0_i32_1 = arith.constant 0 : i32
    return %c0_i32, %c0_i32_0 : i32, i32
  }
  func.func @transform_1(%arg0: i32) -> (i32, i32) {
    %c0_i32 = arith.constant 0 : i32
    %c0_i32_0 = arith.constant 0 : i32
    return %c0_i32, %arg0 : i32, i32
  }
  func.func @transform_2(%arg0: i32) -> (i32, i32) {
    %c0_i32 = arith.constant 0 : i32
    %c0_i32_0 = arith.constant 0 : i32
    %c0_i32_1 = arith.constant 0 : i32
    return %c0_i32, %c0_i32_0 : i32, i32
  }
  func.func @transform_3(%arg0: i32) -> (i32, i32) {
    %c0_i32 = arith.constant 0 : i32
    %c0_i32_0 = arith.constant 0 : i32
    %c0_i32_1 = arith.constant 0 : i32
    return %c0_i32, %c0_i32_0 : i32, i32
  }
  func.func @transform_4(%arg0: i32) -> (i32, i32) {
    %c0_i32 = arith.constant 0 : i32
    %c0_i32_0 = arith.constant 0 : i32
    return %c0_i32, %arg0 : i32, i32
  }
}

module attributes {stable_mosaic.version = 11 : i64} {
  func.func @_grouped_mm_bn_relu_kernel(%arg0: i32, %arg1: i32, %arg2: memref<1x8x72xbf16, #tpu.memory_space<vmem>>, %arg3: memref<1x72x128xbf16, #tpu.memory_space<vmem>>, %arg4: memref<1x8x1xf32, #tpu.memory_space<vmem>>, %arg5: memref<1x8x1xf32, #tpu.memory_space<vmem>>, %arg6: memref<8x128xbf16, #tpu.memory_space<vmem>>) attributes {dimension_semantics = [#tpu.dimension_semantics<parallel>, #tpu.dimension_semantics<parallel>], iteration_bounds = array<i64: 1, 1>, scalar_prefetch = 0 : i64, scratch_operands = 0 : i64, tpu.core_type = #tpu.core_type<tc>, window_params = [{transform_indices = @transform_0, window_bounds = array<i64: 1, 8, 72>}, {transform_indices = @transform_1, window_bounds = array<i64: 1, 72, 128>}, {transform_indices = @transform_2, window_bounds = array<i64: 1, 8, 1>}, {transform_indices = @transform_3, window_bounds = array<i64: 1, 8, 1>}, {transform_indices = @transform_4, window_bounds = array<i64: 8, 128>}]} {
    %c0 = arith.constant 0 : index
    %c0_0 = arith.constant 0 : index
    %c0_1 = arith.constant 0 : index
    %0 = vector.load %arg2[%c0, %c0_0, %c0_1] : memref<1x8x72xbf16, #tpu.memory_space<vmem>>, vector<1x8x72xbf16>
    %1 = vector.shape_cast %0 : vector<1x8x72xbf16> to vector<8x72xbf16>
    %c0_2 = arith.constant 0 : index
    %c0_3 = arith.constant 0 : index
    %c0_4 = arith.constant 0 : index
    %2 = vector.load %arg3[%c0_2, %c0_3, %c0_4] : memref<1x72x128xbf16, #tpu.memory_space<vmem>>, vector<1x72x128xbf16>
    %3 = vector.shape_cast %2 : vector<1x72x128xbf16> to vector<72x128xbf16>
    %cst = arith.constant dense<0.000000e+00> : vector<8x128xf32>
    %4 = tpu.matmul %1, %3, %cst {dimension_numbers = #tpu.dot_dimension_numbers<[1], [0], [0], [1], [0, 0, 1, 1], [], []>} : vector<8x72xbf16>, vector<72x128xbf16>, vector<8x128xf32> -> vector<8x128xf32>
    %c0_5 = arith.constant 0 : index
    %c0_6 = arith.constant 0 : index
    %c0_7 = arith.constant 0 : index
    %5 = vector.load %arg4[%c0_5, %c0_6, %c0_7] : memref<1x8x1xf32, #tpu.memory_space<vmem>>, vector<1x8x1xf32>
    %6 = vector.shape_cast %5 : vector<1x8x1xf32> to vector<8x1xf32>
    %7 = vector.broadcast %6 : vector<8x1xf32> to vector<8x128xf32>
    %8 = arith.mulf %4, %7 : vector<8x128xf32>
    %c0_8 = arith.constant 0 : index
    %c0_9 = arith.constant 0 : index
    %c0_10 = arith.constant 0 : index
    %9 = vector.load %arg5[%c0_8, %c0_9, %c0_10] : memref<1x8x1xf32, #tpu.memory_space<vmem>>, vector<1x8x1xf32>
    %10 = vector.shape_cast %9 : vector<1x8x1xf32> to vector<8x1xf32>
    %11 = vector.broadcast %10 : vector<8x1xf32> to vector<8x128xf32>
    %12 = arith.addf %8, %11 : vector<8x128xf32>
    %cst_11 = arith.constant 0.000000e+00 : f32
    %13 = vector.broadcast %cst_11 : f32 to vector<8x128xf32>
    %14 = arith.maximumf %12, %13 : vector<8x128xf32>
    %15 = arith.truncf %14 : vector<8x128xf32> to vector<8x128xbf16>
    %c0_12 = arith.constant 0 : index
    %c0_13 = arith.constant 0 : index
    %16 = vector.load %arg6[%c0_12, %c0_13] : memref<8x128xbf16, #tpu.memory_space<vmem>>, vector<8x128xbf16>
    tpu.vector_store %arg6[%c0_12, %c0_13], %15 {strides = array<i32>} : memref<8x128xbf16, #tpu.memory_space<vmem>>, vector<8x128xbf16>,
    return
  }
  func.func @transform_0(%arg0: i32, %arg1: i32) -> (i32, i32, i32) {
    %c0_i32 = arith.constant 0 : i32
    %c0_i32_0 = arith.constant 0 : i32
    %c0_i32_1 = arith.constant 0 : i32
    return %arg0, %c0_i32, %c0_i32_0 : i32, i32, i32
  }
  func.func @transform_1(%arg0: i32, %arg1: i32) -> (i32, i32, i32) {
    %c0_i32 = arith.constant 0 : i32
    %c0_i32_0 = arith.constant 0 : i32
    return %arg0, %c0_i32, %arg1 : i32, i32, i32
  }
  func.func @transform_2(%arg0: i32, %arg1: i32) -> (i32, i32, i32) {
    %c0_i32 = arith.constant 0 : i32
    %c0_i32_0 = arith.constant 0 : i32
    %c0_i32_1 = arith.constant 0 : i32
    return %arg0, %c0_i32, %c0_i32_0 : i32, i32, i32
  }
  func.func @transform_3(%arg0: i32, %arg1: i32) -> (i32, i32, i32) {
    %c0_i32 = arith.constant 0 : i32
    %c0_i32_0 = arith.constant 0 : i32
    %c0_i32_1 = arith.constant 0 : i32
    return %arg0, %c0_i32, %c0_i32_0 : i32, i32, i32
  }
  func.func @transform_4(%arg0: i32, %arg1: i32) -> (i32, i32) {
    %c0_i32 = arith.constant 0 : i32
    return %arg0, %arg1 : i32, i32
  }
}

module attributes {stable_mosaic.version = 11 : i64} {
  func.func @_out_proj_kernel(%arg0: i32, %arg1: memref<16x8xbf16, #tpu.memory_space<vmem>>, %arg2: memref<8x128xbf16, #tpu.memory_space<vmem>>, %arg3: memref<16x1xf32, #tpu.memory_space<vmem>>, %arg4: memref<16x1xf32, #tpu.memory_space<vmem>>, %arg5: memref<16x8xbf16, #tpu.memory_space<vmem>>, %arg6: memref<8x128xbf16, #tpu.memory_space<vmem>>, %arg7: memref<16x1xf32, #tpu.memory_space<vmem>>, %arg8: memref<16x1xf32, #tpu.memory_space<vmem>>, %arg9: memref<16x128xf32, #tpu.memory_space<vmem>>) attributes {dimension_semantics = [#tpu.dimension_semantics<parallel>], iteration_bounds = array<i64: 1>, scalar_prefetch = 0 : i64, scratch_operands = 0 : i64, tpu.core_type = #tpu.core_type<tc>, window_params = [{pipeline_mode = #tpu.pipeline_mode<synchronous>, transform_indices = @transform_0, window_bounds = array<i64: 16, 8>}, {transform_indices = @transform_1, window_bounds = array<i64: 8, 128>}, {pipeline_mode = #tpu.pipeline_mode<synchronous>, transform_indices = @transform_2, window_bounds = array<i64: 16, 1>}, {pipeline_mode = #tpu.pipeline_mode<synchronous>, transform_indices = @transform_3, window_bounds = array<i64: 16, 1>}, {pipeline_mode = #tpu.pipeline_mode<synchronous>, transform_indices = @transform_4, window_bounds = array<i64: 16, 8>}, {transform_indices = @transform_5, window_bounds = array<i64: 8, 128>}, {pipeline_mode = #tpu.pipeline_mode<synchronous>, transform_indices = @transform_6, window_bounds = array<i64: 16, 1>}, {pipeline_mode = #tpu.pipeline_mode<synchronous>, transform_indices = @transform_7, window_bounds = array<i64: 16, 1>}, {transform_indices = @transform_8, window_bounds = array<i64: 16, 128>}]} {
    %c0 = arith.constant 0 : index
    %c0_0 = arith.constant 0 : index
    %0 = vector.load %arg1[%c0, %c0_0] : memref<16x8xbf16, #tpu.memory_space<vmem>>, vector<16x8xbf16>
    %c0_1 = arith.constant 0 : index
    %c0_2 = arith.constant 0 : index
    %1 = vector.load %arg2[%c0_1, %c0_2] : memref<8x128xbf16, #tpu.memory_space<vmem>>, vector<8x128xbf16>
    %cst = arith.constant dense<0.000000e+00> : vector<16x128xf32>
    %2 = tpu.matmul %0, %1, %cst {dimension_numbers = #tpu.dot_dimension_numbers<[1], [0], [0], [1], [0, 0, 1, 1], [], []>} : vector<16x8xbf16>, vector<8x128xbf16>, vector<16x128xf32> -> vector<16x128xf32>
    %c0_3 = arith.constant 0 : index
    %c0_4 = arith.constant 0 : index
    %3 = vector.load %arg3[%c0_3, %c0_4] : memref<16x1xf32, #tpu.memory_space<vmem>>, vector<16x1xf32>
    %4 = vector.broadcast %3 : vector<16x1xf32> to vector<16x128xf32>
    %5 = arith.mulf %2, %4 : vector<16x128xf32>
    %c0_5 = arith.constant 0 : index
    %c0_6 = arith.constant 0 : index
    %6 = vector.load %arg4[%c0_5, %c0_6] : memref<16x1xf32, #tpu.memory_space<vmem>>, vector<16x1xf32>
    %7 = vector.broadcast %6 : vector<16x1xf32> to vector<16x128xf32>
    %8 = arith.addf %5, %7 : vector<16x128xf32>
    %c0_7 = arith.constant 0 : index
    %c0_8 = arith.constant 0 : index
    %9 = vector.load %arg5[%c0_7, %c0_8] : memref<16x8xbf16, #tpu.memory_space<vmem>>, vector<16x8xbf16>
    %c0_9 = arith.constant 0 : index
    %c0_10 = arith.constant 0 : index
    %10 = vector.load %arg6[%c0_9, %c0_10] : memref<8x128xbf16, #tpu.memory_space<vmem>>, vector<8x128xbf16>
    %cst_11 = arith.constant dense<0.000000e+00> : vector<16x128xf32>
    %11 = tpu.matmul %9, %10, %cst_11 {dimension_numbers = #tpu.dot_dimension_numbers<[1], [0], [0], [1], [0, 0, 1, 1], [], []>} : vector<16x8xbf16>, vector<8x128xbf16>, vector<16x128xf32> -> vector<16x128xf32>
    %c0_12 = arith.constant 0 : index
    %c0_13 = arith.constant 0 : index
    %12 = vector.load %arg7[%c0_12, %c0_13] : memref<16x1xf32, #tpu.memory_space<vmem>>, vector<16x1xf32>
    %13 = vector.broadcast %12 : vector<16x1xf32> to vector<16x128xf32>
    %14 = arith.mulf %11, %13 : vector<16x128xf32>
    %c0_14 = arith.constant 0 : index
    %c0_15 = arith.constant 0 : index
    %15 = vector.load %arg8[%c0_14, %c0_15] : memref<16x1xf32, #tpu.memory_space<vmem>>, vector<16x1xf32>
    %16 = vector.broadcast %15 : vector<16x1xf32> to vector<16x128xf32>
    %17 = arith.addf %14, %16 : vector<16x128xf32>
    %18 = arith.addf %8, %17 : vector<16x128xf32>
    %cst_16 = arith.constant 0.000000e+00 : f32
    %19 = vector.broadcast %cst_16 : f32 to vector<16x128xf32>
    %20 = arith.maximumf %18, %19 : vector<16x128xf32>
    %c0_17 = arith.constant 0 : index
    %c0_18 = arith.constant 0 : index
    %21 = vector.load %arg9[%c0_17, %c0_18] : memref<16x128xf32, #tpu.memory_space<vmem>>, vector<16x128xf32>
    tpu.vector_store %arg9[%c0_17, %c0_18], %20 {strides = array<i32>} : memref<16x128xf32, #tpu.memory_space<vmem>>, vector<16x128xf32>,
    return
  }
  func.func @transform_0(%arg0: i32) -> (i32, i32) {
    %c0_i32 = arith.constant 0 : i32
    %c0_i32_0 = arith.constant 0 : i32
    %c0_i32_1 = arith.constant 0 : i32
    return %c0_i32, %c0_i32_0 : i32, i32
  }
  func.func @transform_1(%arg0: i32) -> (i32, i32) {
    %c0_i32 = arith.constant 0 : i32
    %c0_i32_0 = arith.constant 0 : i32
    return %c0_i32, %arg0 : i32, i32
  }
  func.func @transform_2(%arg0: i32) -> (i32, i32) {
    %c0_i32 = arith.constant 0 : i32
    %c0_i32_0 = arith.constant 0 : i32
    %c0_i32_1 = arith.constant 0 : i32
    return %c0_i32, %c0_i32_0 : i32, i32
  }
  func.func @transform_3(%arg0: i32) -> (i32, i32) {
    %c0_i32 = arith.constant 0 : i32
    %c0_i32_0 = arith.constant 0 : i32
    %c0_i32_1 = arith.constant 0 : i32
    return %c0_i32, %c0_i32_0 : i32, i32
  }
  func.func @transform_4(%arg0: i32) -> (i32, i32) {
    %c0_i32 = arith.constant 0 : i32
    %c0_i32_0 = arith.constant 0 : i32
    %c0_i32_1 = arith.constant 0 : i32
    return %c0_i32, %c0_i32_0 : i32, i32
  }
  func.func @transform_5(%arg0: i32) -> (i32, i32) {
    %c0_i32 = arith.constant 0 : i32
    %c0_i32_0 = arith.constant 0 : i32
    return %c0_i32, %arg0 : i32, i32
  }
  func.func @transform_6(%arg0: i32) -> (i32, i32) {
    %c0_i32 = arith.constant 0 : i32
    %c0_i32_0 = arith.constant 0 : i32
    %c0_i32_1 = arith.constant 0 : i32
    return %c0_i32, %c0_i32_0 : i32, i32
  }
  func.func @transform_7(%arg0: i32) -> (i32, i32) {
    %c0_i32 = arith.constant 0 : i32
    %c0_i32_0 = arith.constant 0 : i32
    %c0_i32_1 = arith.constant 0 : i32
    return %c0_i32, %c0_i32_0 : i32, i32
  }
  func.func @transform_8(%arg0: i32) -> (i32, i32) {
    %c0_i32 = arith.constant 0 : i32
    %c0_i32_0 = arith.constant 0 : i32
    return %c0_i32, %arg0 : i32, i32
  }
}

</mosaic_0001>

<bundles_post_ra>
// kernel: xblock_forward.3
= control target key start
LH: loop header
LB: loop body
LE: loop exit
PB: predicated region body
PF: predicated region fallthrough
CT: control target
= control target key end

     0   :  { %s379_s15 = smov 0   ;;  %s408_s0 = inlined_call_operand.vmem [shape: bf16[8,8], index: 0, kind: input, shape index: {}]   ;;  %s409_s1 = inlined_call_operand.vmem [shape: bf16[8,512], index: 1, kind: input, shape index: {}]   ;;  %s410_s2 = inlined_call_operand.vmem [shape: f32[8,1], index: 2, kind: input, shape index: {}]   ;;  %s411_s3 = inlined_call_operand.vmem [shape: f32[8,1], index: 3, kind: input, shape index: {}]   ;;  %s412_s4 = inlined_call_operand.vmem [shape: bf16[8,512], index: 4, kind: output, shape index: {}]  }
   0x1 LB: > { %s322_s16 = sadd.s32 4294967295, %s351_s15   ;;  %p326_p0 = scmp.ge.s32.totalorder %s351_s15, 1  ;;  %s351_s15 = sphi %s379_s15, %s14_s15  }
   0x2   : > { %p163_p1 = scmp.lt.s32.totalorder %s351_s15, 3 }
   0x4   : > { %p164_p2 = pnand %p326_p0, %p163_p1 }
   0x5   : > { %s327_s19 = sshll.u32 (!%p164_p2), %s322_s16, 1 }
   0x6   : > { %167 = sbr.rel (%p164_p2) target bundleno = 158 (0x9e), region = 36  ;;  %p190_p3 = scmp.lt.s32.totalorder (!%p164_p2), %s327_s19, 3 }
   0xb   : > { %v246_v0 = vld [vmem:[%s410_s2] sm:$0xff]  ;;  %v353_v1 = vmov 0   ;;  %s414_s19 = smov (!%p190_p3, %s327_s19), 3  ;;  %vm213_vm0 = vcmask 1043456   ;;  %vm209_vm1 = vcmask 64512  }
   0xc   : > { %344 = vset.pattern.permute.xlu0 %v353_v1  ;;  %s328_s20 = sshll.u32 %s414_s19, 2  ;;  %v254_v3 = vld [vmem:[%s411_s3] sm:$0xff] }
   0xd   : > { %249 = vperm.xlu0 %344, %v246_v0   ;;  %s193_s23 = scalar_lea.vmem %s409_s1, %s328_s20  ;;  %v202_v10 = vld [vmem:[%s408_s0] sm:$0xf]  ;;  %s199_s30 = scalar_lea.vmem %s412_s4, %s328_s20 }
   0xe   : > { %v203_v2 = vld [vmem:[%s193_s23] sm:$0xff] }
   0xf   : > { %v205_v4 = vunpack.c.l.b16 %v203_v2  ;;  %v206_v5 = vunpack.c.h.b16 %v203_v2 }
  0x11   : > { %v207_v6 = vpack.c.b16 %v205_v4, %v205_v4  ;;  %v208_v7 = vpack.c.b16 %v206_v5, %v206_v5 }
  0x13   : > { %v215_v8 = vsel %vm213_vm0, %v207_v6, 0  ;;  %v218_v9 = vsel %vm213_vm0, %v208_v7, 0 }
  0x14   : > { %227 = vmatpush.bf16.msra.mxu0 %v215_v8  ;;  %240 = vmatpush.bf16.msra.mxu1 %v218_v9 }
  0x15   : > { %257 = vperm.xlu0 %344, %v254_v3  }
  0x17   : > { %331 = vmatmul.msk.bf16.vlgmr.msra.gmra.mxu0 %vm209_vm1, %v202_v10  ;;  %332 = vmatmul.msk.bf16.vlgmr.msra.gmra.mxu1 %vm209_vm1, %v202_v10 }
  0x7f   : > { %v250_v11 = vpop.permute.xlu0 %249 }
  0x87   : > { %v258_v16 = vpop.permute.xlu0 %257 }
  0x94   : > { %v229_v12 = vpop.f32.mrf.mxu0  ;;  %v242_v13 = vpop.f32.mrf.mxu1 }
  0x95   : > { %v252_v14 = vmul.f32 %v250_v11, %v229_v12  ;;  %v253_v15 = vmul.f32 %v250_v11, %v242_v13 }
  0x97   : > { %v260_v17 = vadd.f32 %v258_v16, %v252_v14  ;;  %v261_v18 = vadd.f32 %v258_v16, %v253_v15 }
  0x99   : > { %v262_v19 = vmax.f32 %v260_v17, 0.0  ;;  %v263_v20 = vmax.f32 %v261_v18, 0.0 }
  0x9b   : > { %v264_v21 = vpack.c.bf16 %v263_v20, %v262_v19 }
  0x9c   : > { %v231_v22 = vpop.f32.mrf.mxu0  ;;  %v244_v23 = vpop.f32.mrf.mxu1 }
  0x9d   : > { %265 = vst [vmem:[%s199_s30] sm:$0xff] %v264_v21 }
  0x9e PF: > { %s14_s15 = sadd.s32 1, %s351_s15  }
  0x9f   : > { %p11_p4 = scmp.ge.s32.totalorder %s14_s15, 4  }
  0xa1   :  { %13 = sbr.rel (!%p11_p4) target bundleno = 1 (0x1), region = 66 }

// kernel: xblock_forward.4
= control target key start
LH: loop header
LB: loop body
LE: loop exit
PB: predicated region body
PF: predicated region fallthrough
CT: control target
= control target key end

     0   :  { %v120_v1 = vmov 0   ;;  %vm59_vm0 = vcmask 1043456   ;;  %vm55_vm1 = vcmask 588800   ;;  %s173_s1 = inlined_call_operand.vmem [shape: bf16[1,72,128], index: 1, kind: input, shape index: {}]   ;;  %s174_s2 = inlined_call_operand.vmem [shape: f32[1,8,1], index: 2, kind: input, shape index: {}]   ;;  %s175_s3 = inlined_call_operand.vmem [shape: f32[1,8,1], index: 3, kind: input, shape index: {}]   ;;  %s176_s0 = inlined_call_operand.vmem [shape: bf16[1,8,72], index: 0, kind: input, shape index: {}]   ;;  %s177_s4 = inlined_call_operand.vmem [shape: bf16[8,128], index: 4, kind: output, shape index: {}]  }
   0x1   :  { %v27_v0 = vld [vmem:[%s173_s1 + $0x20] sm:$0xf]  ;;  %119 = vset.pattern.permute.xlu0 %v120_v1  ;;  %v117_v6 = vld [vmem:[%s173_s1 + $0x18] sm:$0xff]  ;;  %v116_v8 = vld [vmem:[%s173_s1 + $0x10] sm:$0xff] }
   0x2   :  { %v45_v2 = vunpack.c.l.b16 %v27_v0  ;;  %v76_v3 = vld [vmem:[%s174_s2] sm:$0xff]  ;;  %v115_v9 = vld [vmem:[%s173_s1 + $0x8] sm:$0xff] }
   0x3   :  { %79 = vperm.xlu0 %119, %v76_v3   ;;  %v83_v7 = vld [vmem:[%s175_s3] sm:$0xff] }
   0x4   :  { %v50_v4 = vpack.c.b16 %v45_v2, %v45_v2  ;;  %v114_v10 = vld [vmem:[%s173_s1] sm:$0xff] }
   0x5   :  { %v18_v11 = vld [vmem:[%s176_s0] sm:$0xf] }
   0x6   :  { %v61_v5 = vsel %vm59_vm0, %v50_v4, 0 }
   0x7   :  { %66 = vmatpush.bf16.msra.mxu0 %v61_v5 }
   0xb   :  { %67 = vmatpush.bf16.msra.mxu0 %v117_v6  ;;  %86 = vperm.xlu0 %119, %v83_v7  }
   0xf   :  { %68 = vmatpush.bf16.msra.mxu0 %v116_v8 }
  0x13   :  { %69 = vmatpush.bf16.msra.mxu0 %v115_v9 }
  0x17   :  { %70 = vmatpush.bf16.msra.mxu0 %v114_v10 }
  0x1a   :  { %113 = vmatmul.msk.bf16.vlgmr.msra.gmra.mxu0 %vm55_vm1, %v18_v11 }
  0x75   :  { %v80_v12 = vpop.permute.xlu0 %79 }
  0x7d   :  { %v87_v15 = vpop.permute.xlu0 %86 }
  0x97   :  { %v72_v13 = vpop.f32.mrf.mxu0 }
  0x98   :  { %v82_v14 = vmul.f32 %v80_v12, %v72_v13 }
  0x9a   :  { %v89_v16 = vadd.f32 %v87_v15, %v82_v14 }
  0x9c   :  { %v90_v17 = vmax.f32 %v89_v16, 0.0 }
  0x9e   :  { %v91_v18 = vpack.c.bf16 %v90_v17, %v90_v17 }
  0x9f   :  { %v74_v19 = vpop.f32.mrf.mxu0 }
  0xa0   :  { %92 = vst [vmem:[%s177_s4] sm:$0xf] %v91_v18 }

// kernel: xblock_forward.5
= control target key start
LH: loop header
LB: loop body
LE: loop exit
PB: predicated region body
PF: predicated region fallthrough
CT: control target
= control target key end

     0   :  { %vm42_vm0 = vcmask 1043456   ;;  %v170_v0 = vmov 0   ;;  %vm38_vm1 = vcmask 64512   ;;  %s260_s6 = inlined_call_operand.vmem [shape: f32[16,1], index: 6, kind: input, shape index: {}]   ;;  %s261_s2 = inlined_call_operand.vmem [shape: f32[16,1], index: 2, kind: input, shape index: {}]   ;;  %s262_s1 = inlined_call_operand.vmem [shape: bf16[8,128], index: 1, kind: input, shape index: {}]   ;;  %s263_s5 = inlined_call_operand.vmem [shape: bf16[8,128], index: 5, kind: input, shape index: {}]   ;;  %s264_s0 = inlined_call_operand.vmem [shape: bf16[16,8], index: 0, kind: input, shape index: {}]   ;;  %s265_s4 = inlined_call_operand.vmem [shape: bf16[16,8], index: 4, kind: input, shape index: {}]   ;;  %s266_s3 = inlined_call_operand.vmem [shape: f32[16,1], index: 3, kind: input, shape index: {}]   ;;  %s267_s7 = inlined_call_operand.vmem [shape: f32[16,1], index: 7, kind: input, shape index: {}]   ;;  %s268_s8 = inlined_call_operand.vmem [shape: f32[16,128], index: 8, kind: output, shape index: {}]  }
   0x1   :  { %168 = vset.pattern.permute.xlu1 %v170_v0  ;;  %167 = vset.pattern.permute.xlu0 %v170_v0  ;;  %v116_v1 = vld [vmem:[%s260_s6] sm:$0xff]  ;;  %v117_v10 = vld [vmem:[%s260_s6 + $0x8] sm:$0xff] }
   0x2   :  { %v60_v2 = vld [vmem:[%s261_s2] sm:$0xff]  ;;  %120 = vperm.xlu1 %168, %v116_v1   ;;  %169 = vset.pattern.permute.xlu2 %v170_v0  ;;  %v61_v11 = vld [vmem:[%s261_s2 + $0x8] sm:$0xff] }
   0x3   :  { %v32_v3 = vld [vmem:[%s262_s1] sm:$0xf]  ;;  %64 = vperm.xlu0 %167, %v60_v2   ;;  %v75_v12 = vld [vmem:[%s266_s3 + $0x8] sm:$0xff] }
   0x4   :  { %v44_v4 = vsel %vm42_vm0, %v32_v3, 0  ;;  %v90_v5 = vld [vmem:[%s263_s5] sm:$0xf]  ;;  %v131_v13 = vld [vmem:[%s267_s7 + $0x8] sm:$0xff] }
   0x5   :  { %v164_v6 = vld [vmem:[%s264_s0] sm:$0xff]  ;;  %53 = vmatpush.bf16.msra.mxu0 %v44_v4  ;;  %v100_v7 = vsel %vm42_vm0, %v90_v5, 0 }
   0x6   :  { %v165_v8 = vld [vmem:[%s265_s4] sm:$0xff]  ;;  %109 = vmatpush.bf16.msra.mxu1 %v100_v7 }
   0x7   :  { %v74_v9 = vld [vmem:[%s266_s3] sm:$0xff] }
   0x8   :  { %78 = vperm.xlu2 %169, %v74_v9   ;;  %158 = vmatmul.msk.bf16.vlgmr.msra.gmra.mxu0 %vm38_vm1, %v164_v6  ;;  %v130_v14 = vld [vmem:[%s267_s7] sm:$0xff] }
   0x9   :  { %163 = vmatmul.msk.bf16.vlgmr.msra.gmra.mxu1 %vm38_vm1, %v165_v8 }
   0xa   :  { %125 = vperm.xlu1 %168, %v117_v10  }
   0xb   :  { %69 = vperm.xlu0 %167, %v61_v11  }
  0x10   :  { %83 = vperm.xlu2 %169, %v75_v12  }
  0x12   :  { %139 = vperm.xlu1 %168, %v131_v13  }
  0x13   :  { %134 = vperm.xlu0 %167, %v130_v14  }
  0x62   :  { %v79_v18 = vpop.permute.xlu2 %78 }
  0x6a   :  { %v84_v32 = vpop.permute.xlu2 %83 }
  0x74   :  { %v121_v16 = vpop.permute.xlu1 %120 }
  0x75   :  { %v65_v15 = vpop.permute.xlu0 %64 }
  0x7c   :  { %v126_v20 = vpop.permute.xlu1 %125 }
  0x7d   :  { %v70_v17 = vpop.permute.xlu0 %69 }
  0x84   :  { %v140_v34 = vpop.permute.xlu1 %139 }
  0x85   :  { %v55_v19 = vpop.f32.mrf.mxu0  ;;  %v135_v24 = vpop.permute.xlu0 %134 }
  0x86   :  { %v72_v21 = vmul.f32 %v65_v15, %v55_v19  ;;  %v111_v22 = vpop.f32.mrf.mxu1 }
  0x87   :  { %v128_v23 = vmul.f32 %v121_v16, %v111_v22 }
  0x88   :  { %v86_v25 = vadd.f32 %v79_v18, %v72_v21 }
  0x89   :  { %v142_v26 = vadd.f32 %v135_v24, %v128_v23 }
  0x8b   :  { %v144_v27 = vadd.f32 %v142_v26, %v86_v25 }
  0x8d   :  { %v146_v28 = vmax.f32 %v144_v27, 0.0  ;;  %v57_v29 = vpop.f32.mrf.mxu0 }
  0x8e   :  { %v73_v30 = vmul.f32 %v70_v17, %v57_v29  ;;  %v113_v31 = vpop.f32.mrf.mxu1 }
  0x8f   :  { %148 = vst [vmem:[%s268_s8] sm:$0xff] %v146_v28  ;;  %v129_v33 = vmul.f32 %v126_v20, %v113_v31 }
  0x90   :  { %v87_v35 = vadd.f32 %v84_v32, %v73_v30 }
  0x91   :  { %v143_v36 = vadd.f32 %v140_v34, %v129_v33 }
  0x93   :  { %v145_v37 = vadd.f32 %v143_v36, %v87_v35 }
  0x95   :  { %v147_v38 = vmax.f32 %v145_v37, 0.0 }
  0x97   :  { %149 = vst [vmem:[%s268_s8 + $0x8] sm:$0xff] %v147_v38 }

</bundles_post_ra>
